<compile_context>
chip_gen: v6e
topology: v6e:2x2x1
jax: 0.10.0
libtpu: 0.0.40
codegen_flags: <defaults>
</compile_context>

<pallas_src>
import math

import jax
import jax.numpy as jnp
from jax.experimental import pallas as pl
from jax.experimental.pallas import tpu as pltpu


# ---------------------------------------------------------------------------
# Kernel body: elementwise scale of a VMEM tile by an SMEM scalar.
# ---------------------------------------------------------------------------
def _scale_kernel(x_ref, scale_ref, o_ref):
    # Cast the f32 scalar to the input dtype so bf16 inputs do the multiply in
    # native bf16 on the VPU (v6e/v7x) instead of unpack -> f32 mul -> repack.
    o_ref[...] = x_ref[...] * scale_ref[0, 0].astype(x_ref.dtype)
    # TODO(synk): training-mode dropout (p=0.1) is not applied; this matches
    # the PyTorch module in eval mode only.


# ---------------------------------------------------------------------------
# PE table (identical to the PyTorch __init__).
# ---------------------------------------------------------------------------
def make_pe_table(d_model: int, max_seq_len: int, dtype=jnp.float32) -> jnp.ndarray:
    position = jnp.arange(0, max_seq_len, dtype=jnp.float32)[:, None]          # (L, 1)
    div_term = jnp.exp(
        jnp.arange(0, d_model, 2, dtype=jnp.float32) * -(math.log(10000.0) / d_model)
    )                                                                           # (d_model//2,)
    angles = position * div_term                                                # (L, d_model//2)
    pe = jnp.zeros((max_seq_len, d_model), dtype=jnp.float32)
    pe = pe.at[:, 0::2].set(jnp.sin(angles))
    pe = pe.at[:, 1::2].set(jnp.cos(angles))
    return pe[None, :, :].astype(dtype)                                         # (1, L, d_model)


# ---------------------------------------------------------------------------
# Tiling helpers.
# ---------------------------------------------------------------------------
def _sublane_pack(dtype) -> int:
    # Rows per packed VMEM tile: f32 -> 8, bf16 -> 16, int8/fp8 -> 32.
    return max(8, 32 // jnp.dtype(dtype).itemsize)


def _divisors(n: int):
    return [d for d in range(1, n + 1) if n % d == 0]


def _dense_2d_view(B: int, S: int, D: int, pack: int):
    """Pick (R, C) with R*C == B*S*D, folding S-divisors into the row axis so
    the sublane axis is `pack`-dense and the lane axis is a multiple of 128."""
    cands = [(B * g, (S // g) * D) for g in _divisors(S)]
    both = [rc for rc in cands if rc[0] % pack == 0 and rc[1] % 128 == 0]
    if both:
        return max(both, key=lambda rc: rc[1])
    lane = [rc for rc in cands if rc[1] % 128 == 0]
    if lane:
        return max(lane, key=lambda rc: rc[1])
    return B, S * D


def _target_block_bytes() -> int:
    """~4 MiB/block on v6e/v7x (4 double-buffered copies = 16 MiB < 32 MiB
    scoped VMEM), ~2 MiB on v5e and older (16 MiB scoped default)."""
    try:
        kind = jax.devices()[0].device_kind.lower()
    except Exception:
        kind = ""
    if any(v in kind for v in ("v2", "v3", "v4", "v5")):
        return 2 * 1024 * 1024
    return 4 * 1024 * 1024


def _pick_blocks(R: int, C: int, itemsize: int, pack: int, target_bytes: int):
    """Lane-dense columns, pack-dense rows, ~target_bytes per block, and >=2
    blocks for anything >= 1 MiB so both v7x TensorCores get work."""
    # Lane (column) block.
    if C % 128 != 0 or C * pack * itemsize <= target_bytes:
        bC = C
    else:
        bC = min(C, max(128, (target_bytes // (pack * itemsize)) // 128 * 128))
    # Sublane (row) block, grown in multiples of the dtype pack width.
    if R % pack != 0:
        bR = R
    else:
        bR = min(R, max(pack, (target_bytes // max(bC * itemsize, 1)) // pack * pack))
    # Megacore: avoid a single-block grid for mid-size inputs.
    total_bytes = R * C * itemsize
    if total_bytes >= (1 << 20) and pl.cdiv(R, bR) * pl.cdiv(C, bC) < 2:
        if C % 128 == 0 and C >= 256:
            bC = (C // 2) // 128 * 128
        elif R % pack == 0 and R >= 2 * pack:
            bR = (R // 2) // pack * pack
    return bR, bC


# ---------------------------------------------------------------------------
# Wrapper.
# ---------------------------------------------------------------------------
def relative_positional_encoder(x: jnp.ndarray,
                                pe: jnp.ndarray,
                                xscale: float = 1.0,
                                donate_x: bool = False):
    """x: (B, S, D); pe: (1, max_seq_len, D).  Returns (x * xscale, pe[:, :S]).

    Note: this op is pure HBM streaming; where possible prefer fusing the
    multiply into an adjacent op instead of paying a standalone round trip.
    """
    B, S, D = x.shape

    # pe path: eval-mode dropout is identity -> static slice only, no kernel copy.
    pe_out = pe[:, :S, :]

    itemsize = jnp.dtype(x.dtype).itemsize
    pack = _sublane_pack(x.dtype)
    R, C = _dense_2d_view(B, S, D, pack)
    x2 = x.reshape(R, C)                       # contiguous row-major view, free

    bR, bC = _pick_blocks(R, C, itemsize, pack, _target_block_bytes())
    grid = (pl.cdiv(R, bR), pl.cdiv(C, bC))

    # xscale as data (SMEM scalar), not a traced constant -> no recompile per value.
    scale_arr = jnp.full((1, 1), xscale, dtype=jnp.float32)

    x_out2 = pl.pallas_call(
        _scale_kernel,
        out_shape=jax.ShapeDtypeStruct((R, C), x.dtype),
        grid=grid,
        in_specs=[
            pl.BlockSpec((bR, bC), lambda i, j: (i, j)),
            pl.BlockSpec(memory_space=pltpu.MemorySpace.SMEM),
        ],
        out_specs=pl.BlockSpec((bR, bC), lambda i, j: (i, j)),
        compiler_params=pltpu.CompilerParams(
            dimension_semantics=("parallel", "parallel"),
        ),
        input_output_aliases={0: 0} if donate_x else {},
    )(x2, scale_arr)

    return x_out2.reshape(B, S, D), pe_out


if __name__ == "__main__":
    d_model = 32
    max_seq_len = 64
    batch = 2
    seq_len = 8
    xscale = math.sqrt(d_model)

    key = jax.random.PRNGKey(0)
    x = jax.random.normal(key, (batch, seq_len, d_model), dtype=jnp.float32)
    pe_table = make_pe_table(d_model, max_seq_len)

    # Reference (pure JAX, eval-mode dropout = identity).
    x_ref = x * xscale
    pe_ref = pe_table[:, :seq_len, :]

    # 1) Default path (no donation).
    x_out, pe_out = relative_positional_encoder(x, pe_table, xscale=xscale)
    jax.block_until_ready((x_out, pe_out))
    assert x_out.shape == (batch, seq_len, d_model)
    assert pe_out.shape == (1, seq_len, d_model)
    assert jnp.allclose(x_out, x_ref, atol=1e-5), "x mismatch"
    assert jnp.allclose(pe_out, pe_ref, atol=1e-6), "pe mismatch"

    # 2) Donated path: the output reuses x's HBM buffer (input_output_aliases).
    fwd_donated = jax.jit(
        lambda xx: relative_positional_encoder(xx, pe_table, xscale=xscale,
                                               donate_x=True),
        donate_argnums=0)
    x_out_d, _ = fwd_donated(x + 0.0)
    jax.block_until_ready(x_out_d)
    assert jnp.allclose(x_out_d, x_ref, atol=1e-5), "donated x mismatch"

    # 3) bf16 path exercises dtype-aware sublane packing + bf16 VPU multiply.
    x_bf16 = x.astype(jnp.bfloat16)
    x_out_b, _ = relative_positional_encoder(x_bf16, pe_table, xscale=xscale)
    jax.block_until_ready(x_out_b)
    assert x_out_b.dtype == jnp.bfloat16
    assert jnp.allclose(x_out_b.astype(jnp.float32), x_ref, atol=0.15, rtol=0.05), \
        "bf16 x mismatch"

    print("KERNEL_OK")
</pallas_src>

<mosaic_0001>
module attributes {stable_mosaic.version = 11 : i64} {
  func.func @_scale_kernel(%arg0: i32, %arg1: i32, %arg2: memref<2x256xf32, #tpu.memory_space<vmem>>, %arg3: memref<1x1xf32, #tpu.memory_space<smem>>, %arg4: memref<2x256xf32, #tpu.memory_space<vmem>>) attributes {dimension_semantics = [#tpu.dimension_semantics<parallel>, #tpu.dimension_semantics<parallel>], iteration_bounds = array<i64: 1, 1>, scalar_prefetch = 0 : i64, scratch_operands = 0 : i64, tpu.core_type = #tpu.core_type<tc>, window_params = [{transform_indices = @transform_0, window_bounds = array<i64: 2, 256>}, {transform_indices = @transform_1, window_bounds = array<i64: 1, 1>}, {transform_indices = @transform_2, window_bounds = array<i64: 2, 256>}]} {
    %c0 = arith.constant 0 : index
    %c0_0 = arith.constant 0 : index
    %0 = vector.load %arg2[%c0, %c0_0] : memref<2x256xf32, #tpu.memory_space<vmem>>, vector<2x256xf32>
    %c0_1 = arith.constant 0 : index
    %c0_2 = arith.constant 0 : index
    %1 = memref.load %arg3[%c0_1, %c0_2] : memref<1x1xf32, #tpu.memory_space<smem>>
    %2 = vector.broadcast %1 : f32 to vector<2x256xf32>
    %3 = arith.mulf %0, %2 : vector<2x256xf32>
    %c0_3 = arith.constant 0 : index
    %c0_4 = arith.constant 0 : index
    %4 = vector.load %arg4[%c0_3, %c0_4] : memref<2x256xf32, #tpu.memory_space<vmem>>, vector<2x256xf32>
    tpu.vector_store %arg4[%c0_3, %c0_4], %3 {strides = array<i32>} : memref<2x256xf32, #tpu.memory_space<vmem>>, vector<2x256xf32>,
    return
  }
  func.func @transform_0(%arg0: i32, %arg1: i32) -> (i32, i32) {
    %c0_i32 = arith.constant 0 : i32
    return %arg0, %arg1 : i32, i32
  }
  func.func @transform_1(%arg0: i32, %arg1: i32) -> (i32, i32) {
    %c0_i32 = arith.constant 0 : i32
    %c0_i32_0 = arith.constant 0 : i32
    %c0_i32_1 = arith.constant 0 : i32
    return %c0_i32, %c0_i32_0 : i32, i32
  }
  func.func @transform_2(%arg0: i32, %arg1: i32) -> (i32, i32) {
    %c0_i32 = arith.constant 0 : i32
    return %arg0, %arg1 : i32, i32
  }
}

</mosaic_0001>

<bundles_post_ra>
// kernel: tpu_custom_call.1
= control target key start
LH: loop header
LB: loop body
LE: loop exit
PB: predicated region body
PF: predicated region fallthrough
CT: control target
= control target key end

     0   :  { %8 = vsyncpa [#allocation4], 0  ;;  %s117_s0 = inlined_call_operand.hbm [shape: f32[2,256], index: 0, kind: input, shape index: {}]   ;;  %s118_s1 = inlined_call_operand.<no memory space> [shape: f32[1,1], index: 1, kind: input, shape index: {}]   ;;  %s119_s2 = inlined_call_operand.hbm [shape: f32[2,256], index: 2, kind: output, shape index: {}]  }
   0x1   :  { %9 = vsyncpa [#allocation5], 0  ;;  %s91_s9 = smov [#allocation3]  }
   0x2   :  { %s16_s10 = sshll.u32 %s91_s9, 4  ;;  %s17_s10 = int_to_ptr.vmem [resolvable:$true] %s16_s10 }
   0x3   :  { %s55_s11 = scalar_lea.vmem %s17_s10, 64  ;;  %p60_p1 = scmp.lt.s32.totalorder %s17_s10, %s17_s10 }
   0x4   :  { %p56_p0 = scmp.ne.s32.totalorder %s17_s10, %s55_s11  ;;  %p61_p2 = scmp.lt.s32.totalorder %s55_s11, %s55_s11 }
   0x6   :  { %p62_p3 = por %p61_p2, %p60_p1 }
   0x8   :  { %p63_p4 = pnand %p62_p3, %p56_p0 }
   0xa   :  { %66 = shalt.err (!%p63_p4)
}
   0xb   :  { %19 = dma.hbm_to_vmem [thread:$0]  %s117_s0, 64, %s17_s10, [#allocation4]  }
   0xc   :  { %87 = dma.done.wait [#allocation4], 64  }
   0xd   :  { %88 = vsyncadd [#allocation4], 4294967232  ;;  %v27_v0 = vstv %s118_s1  ;;  %s92_s16 = smov [#allocation6]   ;;  %v25_v1 = vld [vmem:[#allocation3] sm:$0xf] }
   0xe   :  { %s36_s17 = sshll.u32 %s92_s16, 4  ;;  %v28_v2 = vmul.f32 %v27_v0, %v25_v1  ;;  %s37_s17 = int_to_ptr.vmem [resolvable:$true] %s36_s17 }
   0xf   :  { %s67_s18 = scalar_lea.vmem %s37_s17, 64  ;;  %p72_p6 = scmp.lt.s32.totalorder %s37_s17, %s37_s17 }
  0x10   :  { %29 = vst [vmem:[#allocation6] sm:$0xf] %v28_v2  ;;  %p68_p5 = scmp.ne.s32.totalorder %s37_s17, %s67_s18  ;;  %p73_p7 = scmp.lt.s32.totalorder %s67_s18, %s67_s18 }
  0x12   :  { %p74_p8 = por %p73_p7, %p72_p6 }
  0x14   :  { %p75_p9 = pnand %p74_p8, %p68_p5 }
  0x16   :  { %78 = shalt.err (!%p75_p9)
}
  0x17   :  { %39 = dma.vmem_to_hbm [thread:$0]  %s37_s17, 64, %s119_s2, [#allocation5]  }
  0x18   :  { %89 = dma.done.wait [#allocation5], 64  }
  0x19   :  { %90 = vsyncadd [#allocation5], 4294967232 }
  0x1a   :  { %43 = vsyncpa [#allocation4], 1 }
  0x1b   :  { %44 = vsyncpa [#allocation5], 1 }

</bundles_post_ra>
